<compile_context>
chip_gen: v7x
topology: tpu7x:2x2x1
jax: 0.10.0
libtpu: 0.0.40
codegen_flags: <defaults>
</compile_context>

<pallas_src>
import functools

import jax
import jax.numpy as jnp
from jax import lax
from jax.experimental import pallas as pl
from jax.experimental.pallas import tpu as pltpu


def _centerloss_kernel(lbl_ref, x_ref, c_ref, out_ref, acc_ref,
                       *, batch, num_classes, block_batch):
    t = pl.program_id(0)
    nt = pl.num_programs(0)

    @pl.when(t == 0)
    def _init():
        acc_ref[...] = jnp.zeros_like(acc_ref)

    # Cast once to f32 up front (v5e VPU has no bf16; MXU accumulates in f32).
    x = x_ref[...].astype(jnp.float32)          # (tB, D)
    c = c_ref[...].astype(jnp.float32)          # (C, D), VMEM-resident
    lbl = lbl_ref[...]                          # (tB, 1) int32

    # One-hot MXU gather: g[i] = centers[labels[i]].
    classes = lax.broadcasted_iota(jnp.int32, (block_batch, num_classes), 1)
    onehot = (lbl == classes).astype(jnp.float32)                    # (tB, C)
    g = jnp.dot(onehot, c, preferred_element_type=jnp.float32)       # (tB, D)

    # Fused squared distance: sum((x - c_y)^2) == ||x||^2 + ||c_y||^2 - 2 x.c_y
    diff = x - g
    d = jnp.sum(diff * diff, axis=1, keepdims=True)                  # (tB, 1)
    d = jnp.clip(d, 1e-12, 1.0e12)

    # Mask ragged-tail padding rows (mask BEFORE accumulating).
    rows = t * block_batch + lax.broadcasted_iota(jnp.int32, d.shape, 0)
    d = jnp.where(rows < batch, d, 0.0)

    acc_ref[...] += d

    @pl.when(t == nt - 1)
    def _finalize():
        # torch clamps AFTER masking: every unmasked (B, C) entry adds 1e-12.
        extra = jnp.float32(batch * (num_classes - 1) * 1e-12)
        total = jnp.sum(acc_ref[...], keepdims=True)                 # (1, 1)
        out_ref[...] = (total + extra) * jnp.float32(1.0 / batch)


def center_loss(x, centers, labels, *, block_batch=None):
    """x: (B, D) float, centers: (C, D) float, labels: (B,) int -> scalar f32."""
    B, D = x.shape
    C, Dc = centers.shape
    assert D == Dc
    labels2d = labels.astype(jnp.int32).reshape(B, 1)

    # Large batch tiles: per-grid-step overhead amortized, HBM-roofline streaming.
    if block_batch is None:
        block_batch = 512
    block_batch = min(block_batch, B)
    if block_batch != B and block_batch % 8 != 0:    # keep sublane dim 8-aligned
        block_batch = max(8, (block_batch // 8) * 8)
    nt = pl.cdiv(B, block_batch)

    kernel = functools.partial(
        _centerloss_kernel, batch=B, num_classes=C, block_batch=block_batch)

    grid_spec = pltpu.PrefetchScalarGridSpec(
        num_scalar_prefetch=0,
        grid=(nt,),
        in_specs=[
            pl.BlockSpec((block_batch, 1), lambda t: (t, 0)),   # labels tile
            pl.BlockSpec((block_batch, D), lambda t: (t, 0)),   # x tile (streamed)
            pl.BlockSpec((C, D), lambda t: (0, 0)),             # centers, resident
        ],
        out_specs=pl.BlockSpec((1, 1), lambda t: (0, 0)),       # resident scalar out
        scratch_shapes=[pltpu.VMEM((block_batch, 1), jnp.float32)],  # per-row accum
    )

    # Rough VMEM footprint (double-buffered x / labels tiles + resident centers),
    # counting lane padding to 128.
    def _rup(v, m):
        return (v + m - 1) // m * m
    d_pad = _rup(D, 128)
    vmem_est = (2 * block_batch * d_pad * x.dtype.itemsize
                + 2 * block_batch * 128 * 4
                + 2 * _rup(C, 8) * d_pad * centers.dtype.itemsize
                + block_batch * 128 * 4)
    compiler_kwargs = dict(dimension_semantics=("arbitrary",))
    if vmem_est > (16 << 20):
        compiler_kwargs["vmem_limit_bytes"] = int(min(max(2 * vmem_est, 32 << 20),
                                                      100 << 20))

    cost = pl.CostEstimate(
        flops=2 * B * C * D + 4 * B * D,
        transcendentals=0,
        bytes_accessed=(B * D * x.dtype.itemsize
                        + C * D * centers.dtype.itemsize
                        + B * 4 + 4),
    )

    out = pl.pallas_call(
        kernel,
        out_shape=jax.ShapeDtypeStruct((1, 1), jnp.float32),
        grid_spec=grid_spec,
        compiler_params=pltpu.CompilerParams(**compiler_kwargs),
        cost_estimate=cost,
    )(labels2d, x, centers)
    return out[0, 0]


def _reference(x, centers, labels):
    # Pure-JAX replica of the torch forward (expansion + mask + clamp-after-mask).
    B = x.shape[0]
    C = centers.shape[0]
    x = x.astype(jnp.float32)
    c = centers.astype(jnp.float32)
    distmat = (
        jnp.sum(x * x, axis=1, keepdims=True)
        + jnp.sum(c * c, axis=1)[None, :]
        - 2.0 * jnp.dot(x, c.T, precision=lax.Precision.HIGHEST)
    )
    mask = (labels[:, None] == jnp.arange(C)[None, :]).astype(jnp.float32)
    return jnp.sum(jnp.clip(distmat * mask, 1e-12, 1.0e12)) / B


if __name__ == "__main__":
    # Module __init__ shapes: centers is (num_classes, feat_dim), normal(0, 1).
    num_classes = 10
    feat_dim = 32
    batch = 12          # deliberately not a multiple of the batch tile

    key = jax.random.PRNGKey(0)
    kx, kc, kl = jax.random.split(key, 3)

    x = jax.random.normal(kx, (batch, feat_dim), dtype=jnp.float32)
    centers = jax.random.normal(kc, (num_classes, feat_dim), dtype=jnp.float32)
    labels = jax.random.randint(kl, (batch,), 0, num_classes, dtype=jnp.int32)

    # block_batch=8 -> 2 grid steps: exercises accumulation + ragged-tail mask.
    loss = center_loss(x, centers, labels, block_batch=8)
    jax.block_until_ready(loss)

    ref = _reference(x, centers, labels)
    assert jnp.allclose(loss, ref, rtol=1e-5, atol=1e-5), (loss, ref)

    # Also check the default (single-tile) path.
    loss2 = center_loss(x, centers, labels)
    jax.block_until_ready(loss2)
    assert jnp.allclose(loss2, ref, rtol=1e-5, atol=1e-5), (loss2, ref)

    print("KERNEL_OK")
</pallas_src>

<mosaic_0001>
module attributes {stable_mosaic.version = 11 : i64} {
  func.func @_centerloss_kernel(%arg0: i32, %arg1: memref<8x1xi32, #tpu.memory_space<vmem>>, %arg2: memref<8x32xf32, #tpu.memory_space<vmem>>, %arg3: memref<10x32xf32, #tpu.memory_space<vmem>>, %arg4: memref<1x1xf32, #tpu.memory_space<vmem>>, %arg5: memref<8x1xf32, #tpu.memory_space<vmem>>) attributes {dimension_semantics = [#tpu.dimension_semantics<arbitrary>], iteration_bounds = array<i64: 2>, scalar_prefetch = 0 : i64, scratch_operands = 1 : i64, tpu.core_type = #tpu.core_type<tc>, window_params = [{transform_indices = @transform_0, window_bounds = array<i64: 8, 1>}, {transform_indices = @transform_1, window_bounds = array<i64: 8, 32>}, {pipeline_mode = #tpu.pipeline_mode<synchronous>, transform_indices = @transform_2, window_bounds = array<i64: 10, 32>}, {pipeline_mode = #tpu.pipeline_mode<synchronous>, transform_indices = @transform_3, window_bounds = array<i64: 1, 1>}]} {
    %c0_i32 = arith.constant 0 : i32
    %0 = arith.cmpi eq, %arg0, %c0_i32 : i32
    %1 = arith.extui %0 : i1 to i32
    %c0_i32_0 = arith.constant 0 : i32
    %2 = arith.cmpi ne, %1, %c0_i32_0 : i32
    scf.if %2 {
      %cst_15 = arith.constant 0.000000e+00 : f32
      %34 = vector.broadcast %cst_15 : f32 to vector<8x1xf32>
      %c0_16 = arith.constant 0 : index
      %c0_17 = arith.constant 0 : index
      %35 = vector.load %arg5[%c0_16, %c0_17] : memref<8x1xf32, #tpu.memory_space<vmem>>, vector<8x1xf32>
      tpu.vector_store %arg5[%c0_16, %c0_17], %34 {strides = array<i32>} : memref<8x1xf32, #tpu.memory_space<vmem>>, vector<8x1xf32>,
    } else {
    }
    %c0 = arith.constant 0 : index
    %c0_1 = arith.constant 0 : index
    %3 = vector.load %arg2[%c0, %c0_1] : memref<8x32xf32, #tpu.memory_space<vmem>>, vector<8x32xf32>
    %c0_2 = arith.constant 0 : index
    %c0_3 = arith.constant 0 : index
    %4 = vector.load %arg3[%c0_2, %c0_3] : memref<10x32xf32, #tpu.memory_space<vmem>>, vector<10x32xf32>
    %c0_4 = arith.constant 0 : index
    %c0_5 = arith.constant 0 : index
    %5 = vector.load %arg1[%c0_4, %c0_5] : memref<8x1xi32, #tpu.memory_space<vmem>>, vector<8x1xi32>
    %6 = tpu.iota {dimensions = array<i32: 1>} : vector<8x10xi32>
    %7 = vector.broadcast %5 : vector<8x1xi32> to vector<8x10xi32>
    %8 = arith.cmpi eq, %7, %6 : vector<8x10xi32>
    %9 = arith.extui %8 : vector<8x10xi1> to vector<8x10xi32>
    %10 = arith.sitofp %9 : vector<8x10xi32> to vector<8x10xf32>
    %cst = arith.constant dense<0.000000e+00> : vector<8x32xf32>
    %11 = tpu.matmul %10, %4, %cst {dimension_numbers = #tpu.dot_dimension_numbers<[1], [0], [0], [1], [0, 0, 1, 1], [], []>} : vector<8x10xf32>, vector<10x32xf32>, vector<8x32xf32> -> vector<8x32xf32>
    %12 = arith.subf %3, %11 : vector<8x32xf32>
    %13 = arith.mulf %12, %12 : vector<8x32xf32>
    %cst_6 = arith.constant dense<0.000000e+00> : vector<8xf32>
    %14 = vector.multi_reduction <add>, %13, %cst_6 [1] : vector<8x32xf32> to vector<8xf32>
    %15 = vector.shape_cast %14 : vector<8xf32> to vector<8x1xf32>
    %cst_7 = arith.constant 9.99999996E-13 : f32
    %cst_8 = arith.constant 9.99999995E+11 : f32
    %16 = vector.broadcast %cst_7 : f32 to vector<8x1xf32>
    %17 = arith.maximumf %16, %15 : vector<8x1xf32>
    %18 = vector.broadcast %cst_8 : f32 to vector<8x1xf32>
    %19 = arith.minimumf %18, %17 : vector<8x1xf32>
    %c8_i32 = arith.constant 8 : i32
    %20 = arith.muli %arg0, %c8_i32 : i32
    %21 = tpu.iota {dimensions = array<i32: 0>} : vector<8x1xi32>
    %22 = vector.broadcast %20 : i32 to vector<8x1xi32>
    %23 = arith.addi %22, %21 : vector<8x1xi32>
    %c12_i32 = arith.constant 12 : i32
    %24 = vector.broadcast %c12_i32 : i32 to vector<8x1xi32>
    %25 = arith.cmpi slt, %23, %24 : vector<8x1xi32>
    %cst_9 = arith.constant 0.000000e+00 : f32
    %26 = vector.broadcast %cst_9 : f32 to vector<8x1xf32>
    %27 = arith.select %25, %19, %26 : vector<8x1xi1>, vector<8x1xf32>
    %c0_10 = arith.constant 0 : index
    %c0_11 = arith.constant 0 : index
    %28 = vector.load %arg5[%c0_10, %c0_11] : memref<8x1xf32, #tpu.memory_space<vmem>>, vector<8x1xf32>
    %29 = arith.addf %28, %27 : vector<8x1xf32>
    %c0_12 = arith.constant 0 : index
    %c0_13 = arith.constant 0 : index
    %30 = vector.load %arg5[%c0_12, %c0_13] : memref<8x1xf32, #tpu.memory_space<vmem>>, vector<8x1xf32>
    tpu.vector_store %arg5[%c0_12, %c0_13], %29 {strides = array<i32>} : memref<8x1xf32, #tpu.memory_space<vmem>>, vector<8x1xf32>,
    %c1_i32 = arith.constant 1 : i32
    %31 = arith.cmpi eq, %arg0, %c1_i32 : i32
    %32 = arith.extui %31 : i1 to i32
    %c0_i32_14 = arith.constant 0 : i32
    %33 = arith.cmpi ne, %32, %c0_i32_14 : i32
    scf.if %33 {
      %c0_15 = arith.constant 0 : index
      %c0_16 = arith.constant 0 : index
      %34 = vector.load %arg5[%c0_15, %c0_16] : memref<8x1xf32, #tpu.memory_space<vmem>>, vector<8x1xf32>
      %35 = vector.shape_cast %34 : vector<8x1xf32> to vector<1x8x1xf32>
      %cst_17 = arith.constant dense<0.000000e+00> : vector<1xf32>
      %36 = vector.multi_reduction <add>, %35, %cst_17 [1, 2] : vector<1x8x1xf32> to vector<1xf32>
      %37 = vector.shape_cast %36 : vector<1xf32> to vector<1x1x1xf32>
      %38 = vector.extract %37[0, 0, 0] : f32 from vector<1x1x1xf32>
      %39 = vector.broadcast %38 : f32 to vector<1x1xf32>
      %cst_18 = arith.constant 1.080000e-10 : f32
      %40 = vector.broadcast %cst_18 : f32 to vector<1x1xf32>
      %41 = arith.addf %39, %40 : vector<1x1xf32>
      %cst_19 = arith.constant 0.0833333358 : f32
      %42 = vector.broadcast %cst_19 : f32 to vector<1x1xf32>
      %43 = arith.mulf %41, %42 : vector<1x1xf32>
      %c0_20 = arith.constant 0 : index
      %c0_21 = arith.constant 0 : index
      %44 = vector.load %arg4[%c0_20, %c0_21] : memref<1x1xf32, #tpu.memory_space<vmem>>, vector<1x1xf32>
      tpu.vector_store %arg4[%c0_20, %c0_21], %43 {strides = array<i32>} : memref<1x1xf32, #tpu.memory_space<vmem>>, vector<1x1xf32>,
    } else {
    }
    return
  }
  func.func @transform_0(%arg0: i32) -> (i32, i32) {
    %c0_i32 = arith.constant 0 : i32
    %c0_i32_0 = arith.constant 0 : i32
    return %arg0, %c0_i32 : i32, i32
  }
  func.func @transform_1(%arg0: i32) -> (i32, i32) {
    %c0_i32 = arith.constant 0 : i32
    %c0_i32_0 = arith.constant 0 : i32
    return %arg0, %c0_i32 : i32, i32
  }
  func.func @transform_2(%arg0: i32) -> (i32, i32) {
    %c0_i32 = arith.constant 0 : i32
    %c0_i32_0 = arith.constant 0 : i32
    %c0_i32_1 = arith.constant 0 : i32
    return %c0_i32, %c0_i32_0 : i32, i32
  }
  func.func @transform_3(%arg0: i32) -> (i32, i32) {
    %c0_i32 = arith.constant 0 : i32
    %c0_i32_0 = arith.constant 0 : i32
    %c0_i32_1 = arith.constant 0 : i32
    return %c0_i32, %c0_i32_0 : i32, i32
  }
}

</mosaic_0001>

<bundles_post_ra>
// kernel: tpu_custom_call.1
= control target key start
LH: loop header
LB: loop body
LE: loop exit
PB: predicated region body
PF: predicated region fallthrough
CT: control target
= control target key end

     0   :  { %8 = vsyncpa [#allocation4], 0  ;;  %s644_s0 = inlined_call_operand.vmem [shape: s32[12,1], index: 0, kind: input, shape index: {}]   ;;  %s645_s1 = inlined_call_operand.vmem [shape: f32[12,32], index: 1, kind: input, shape index: {}]   ;;  %s646_s2 = inlined_call_operand.hbm [shape: f32[10,32], index: 2, kind: input, shape index: {}]   ;;  %s647_s3 = inlined_call_operand.hbm [shape: f32[1,1], index: 3, kind: output, shape index: {}]  }
   0x1   :  { %9 = vsyncpa [#allocation5], 0  ;;  %s560_s12 = smov 0  }
   0x2 LB: > { %s566_s13 = sadd.s32 4294967295, %s528_s12   ;;  %p392_p0 = scmp.ge.s32.totalorder %s528_s12, 1  ;;  %s528_s12 = sphi %s560_s12, %s15_s12  }
   0x3   : > { %p114_p1 = scmp.lt.s32.totalorder %s528_s12, 3  ;;  %s530_s14 = smov [#allocation3]  }
   0x4   : > { %s126_s15 = sshll.u32 %s530_s14, 4  ;;  %p648_p4 = scmp.eq.s32.totalorder %s566_s13, 0  ;;  %s127_s15 = int_to_ptr.vmem [resolvable:$true] %s126_s15 }
   0x5   : > { %p571_p3 = pnand %p392_p0, %p114_p1  ;;  %s460_s20 = scalar_lea.hbm %s646_s2, 256 }
   0x6   : > { %p461_p7 = scmp.ne.s32.totalorder %s646_s2, %s460_s20  ;;  %p467_p11 = scmp.lt.u32.totalorder %s460_s20, %s646_s2 }
   0x7   : > { %s650_s16 = scalar_select %p571_p3, 1, 0 }
   0x8   : > { %p433_p5 = pneg %p571_p3 }
   0xa   : > { %p580_p6 = pnand %p648_p4, %p433_p5 }
   0xc   : > { %p462_p8 = pneg %p580_p6 }
   0xe   : > { %p463_p9 = pnand %p462_p8, %p461_p7 }
  0x10   : > { %p464_p10 = pneg %p463_p9 }
  0x12   : > { %p469_p12 = pnand %p467_p11, %p464_p10 }
  0x14   : > { %472 = shalt.err (!%p469_p12)
}
  0x15   : > { %s473_s25 = scalar_lea.vmem %s127_s15, 256  ;;  %p481_p5 = scmp.lt.s32.totalorder %s127_s15, %s127_s15 }
  0x16   : > { %p474_p13 = scmp.ne.s32.totalorder %s127_s15, %s473_s25  ;;  %p482_p2 = scmp.lt.s32.totalorder %s473_s25, %s473_s25 }
  0x18   : > { %p476_p0 = pnand %p474_p13, %p462_p8  ;;  %p483_p4 = por %p482_p2, %p481_p5 }
  0x1a   : > { %p477_p1 = pneg %p476_p0 }
  0x1c   : > { %p484_p3 = pnand %p483_p4, %p477_p1 }
  0x1e   : > { %487 = shalt.err (!%p484_p3)
}
  0x1f   : > { %s531_s26 = smov 128   ;;  %s532_s27 = smov 8  }
  0x20   : > { %436 = dma.hbm_to_vmem [thread:$0]  (!%p580_p6), %s646_s2, 256, %s127_s15, [#allocation4], %s531_s26, %s531_s26, %s532_s27  }
  0x21   : > { %p652_p7 = scmp.ne.s32.totalorder %s650_s16, 0 }
  0x22   : > { %p653_p9 = scmp.eq.s32.totalorder (!%p652_p7), %s566_s13, 0 }
  0x23   : > { %156 = sbr.rel (%p652_p7) target bundleno = 795 (0x31b), region = 32 }
  0x2a   : > { %519 = dma.done.wait (%p653_p9), [#allocation4], 256   ;;  %p654_p8 = pmov %p653_p9 }
  0x2b   : > { %p178_p2 = scmp.lt.s32.totalorder %s566_s13, 1  ;;  %p655_p3 = scmp.ne.s32.totalorder %s566_s13, 0 }
  0x2c   : > { %521 = vsyncadd (%p654_p8), [#allocation4], 4294967040  ;;  %vm190_vm0 = vcmask (!%p655_p3), 7168   ;;  %v533_v0 = vmov (!%p655_p3), 0.0  }
  0x2d   : > { %s179_s30 = scalar_select %p178_p2, %s566_s13, 1 }
  0x2e   : > { %189 = sbr.rel (%p655_p3) target bundleno = 53 (0x35), region = 40  ;;  %191 = vst.msk [vmem:[#allocation2] sm:$0xff] (!%p655_p3), %vm190_vm0, %v533_v0 }
  0x2f   : > { %s397_s4 = sshll.u32 %s179_s30, 3 }
  0x30   : > { %s181_s7 = scalar_lea.vmem %s644_s0, %s397_s4  ;;  %s185_s10 = scalar_lea.vmem %s645_s1, %s397_s4 }
  0x35 PF: > { %v195_v1 = vld [vmem:[%s181_s7] sm:$0xff]  ;;  %v193_v2 = vld [vmem:[#allocation3] sm:$0xff]  ;;  %v194_v3 = vld [vmem:[#allocation3 + $0x8] sm:$0x3]  ;;  %v534_v4 = vmov 0   ;;  %v535_v5 = vmov 0.0|0.0   ;;  %v196_v8 = vlaneseq }
  0x36   : > { %459 = vset.pattern.permute.xlu0 %v534_v4  ;;  %419 = vmatprep.subr.bf16.mxu0 %v535_v5  ;;  %vm208_vm1 = vcmask 1041408   ;;  %v420_v6 = vpack.c.bf16 %v194_v3, %v193_v2  ;;  %vm536_vm2 = vmmov 1   ;;  %vm537_vm4 = vmmov 0   ;;  %v192_v12 = vld [vmem:[%s185_s10] sm:$0xff]  ;;  %s403_s11 = sshll.u32 %s566_s13, 3  ;;  %p404_p4 = scmp.ne.s32.totalorder %s566_s13, 1 }
  0x37   : > { %199 = vperm.xlu0 %459, %v195_v1   ;;  %vm421_vm3 = vmpackc.low %vm208_vm1, %vm536_vm2  ;;  %v538_v7 = vmov 0.0   ;;  %v197_v9 = vand.u32 127, %v196_v8  ;;  %vm204_vm5 = vcmask 80896   ;;  %vm284_vm7 = vcmask 261120   ;;  %v297_v23 = vld [vmem:[#allocation2] sm:$0xff] }
  0x38   : > { %422 = vmatpush3.bf16.msk.msra.mxu0 %vm421_vm3, %v420_v6  ;;  %416 = vmatprep.mubr.msk.f32.mxu0 %vm537_vm4, %v538_v7  ;;  %v292_v18 = vshrl.u32 %v196_v8, 7  ;;  %v293_v19 = vstv %s403_s11  ;;  %vm299_vm9 = vcmask 7168   ;;  %vm319_vm10 = vcmask (!%p404_p4), 0  }
  0x3a   : > { %v294_v20 = vadd.s32 %v293_v19, %v292_v18 }
  0x3c   : > { %vm295_vm8 = vcmp.lt.s32.totalorder %v294_v20, 12 }
  0xb6   : > { %v200_v10 = vpop.permute.xlu0 %199 }
  0xb7   : > { %vm201_vm6 = vcmp.eq.s32.totalorder %v200_v10, %v197_v9 }
  0xb8   : > { %v400_v11 = vsel %vm201_vm6, 1.0, %v538_v7 }
  0xb9   : > { %417 = vmatmul.mubr.msk.f32.vlgmr.msra.gmra.mrb[0].mxu0 %vm204_vm5, %v400_v11 }
 0x18c   : > { %v278_v13 = vpop.f32.mrb[0].mxu0 }
 0x18d   : > { %v282_v14 = vsub.f32 %v192_v12, %v278_v13  ;;  %v418_v15 = vpop.f32.mrb[1].mxu0 }
 0x18f   : > { %v283_v16 = vmul.f32 %v282_v14, %v282_v14 }
 0x191   : > { %v285_v17 = vsel %vm284_vm7, %v283_v16, 0.0 }
 0x192   : > { %286 = vadd.xlane.f32.xlu0 %v285_v17 }
 0x21f   : > { %v287_v21 = vpop.xlane.xlu0 %286 }
 0x220   : > { %v288_v22 = vmax.f32 %v287_v21, 1e-12 }
 0x221   : > { %304 = sbr.rel (%p404_p4) target bundleno = 770 (0x302), region = 44 }
 0x222   : > { %v289_v24 = vmin.f32 %v288_v22, 1e+12 }
 0x224   : > { %v296_v25 = vsel %vm295_vm8, %v289_v24, 0.0 }
 0x225   : > { %v298_v26 = vadd.f32 %v297_v23, %v296_v25 }
 0x227   : > { %300 = vst.msk [vmem:[#allocation2] sm:$0xff] %vm299_vm9, %v298_v26 }
 0x22e   : > { %v305_v27 = vld [vmem:[#allocation2] sm:$0xff] }
 0x22f   : > { %v306_v28 = vsel %vm299_vm9, %v305_v27, 0.0 }
 0x230   : > { %307 = vadd.xlane.f32.xlu0 %v306_v28 }
 0x2bd   : > { %v308_v29 = vpop.xlane.xlu0 %307 }
 0x2be   : > { %v309_v30 = vrot.slane %v308_v29, 4 }
 0x2c0   : > { %v310_v31 = vadd.f32 %v309_v30, %v308_v29 }
 0x2c2   : > { %v311_v32 = vrot.slane %v310_v31, 2 }
 0x2c4   : > { %v312_v33 = vadd.f32 %v311_v32, %v310_v31 }
 0x2c6   : > { %v313_v34 = vrot.slane %v312_v33, 1 }
 0x2c8   : > { %v314_v35 = vadd.f32 %v313_v34, %v312_v33 }
 0x2ca   : > { %423 = vpush %v314_v35 }
 0x2fb   : > { %s424_s14 = spop %423 }
 0x2fc   : > { %v316_v36 = vstv %s424_s14 }
 0x2fd   : > { %v317_v37 = vadd.f32 1.08e-10, %v316_v36 }
 0x2ff   : > { %v318_v38 = vmul.f32 0.083333336, %v317_v37 }
 0x301   : > { %320 = vst.msk [vmem:[#allocation6] sm:$0x1] %vm319_vm10, %v318_v38 }
 0x302 PF: > { %p439_p6 = scmp.eq.s32.totalorder %s566_s13, 1  ;;  %s539_s15 = smov [#allocation6]  }
 0x303   : > { %s328_s16 = sshll.u32 %s539_s15, 4  ;;  %s329_s16 = int_to_ptr.vmem [resolvable:$true] %s328_s16 }
 0x304   : > { %s488_s17 = scalar_lea.vmem %s329_s16, 16  ;;  %s494_s18 = scalar_lea.vmem %s329_s16, 32 }
 0x305   : > { %p489_p10 = scmp.ne.s32.totalorder %s329_s16, %s488_s17  ;;  %p495_p13 = scmp.lt.s32.totalorder %s329_s16, %s329_s16 }
 0x306   : > { %p496_p0 = scmp.lt.s32.totalorder %s494_s18, %s488_s17 }
 0x307   : > { %p490_p11 = pnand %p489_p10, %p439_p6 }
 0x308   : > { %p497_p1 = por %p496_p0, %p495_p13 }
 0x309   : > { %p491_p12 = pneg %p490_p11 }
 0x30b   : > { %p498_p5 = pnand %p497_p1, %p491_p12 }
 0x30d   : > { %501 = shalt.err (!%p498_p5)
}
 0x30e   : > { %s502_s21 = scalar_lea.hbm %s647_s3, 16 }
 0x30f   : > { %p503_p7 = scmp.ne.s32.totalorder %s647_s3, %s502_s21  ;;  %p508_p2 = scmp.lt.u32.totalorder %s502_s21, %s647_s3 }
 0x311   : > { %p504_p9 = pnand %p503_p7, %p439_p6 }
 0x313   : > { %p505_p8 = pneg %p504_p9 }
 0x315   : > { %p510_p3 = pnand %p508_p2, %p505_p8 }
 0x317   : > { %513 = shalt.err (!%p510_p3)
}
 0x318   : > { %430 = dma.vmem_to_hbm [thread:$0]  (%p439_p6), %s329_s16, 16, %s647_s3, [#allocation5]  }
 0x319   : > { %523 = dma.done.wait (%p439_p6), [#allocation5], 16  }
 0x31a   : > { %525 = vsyncadd (%p439_p6), [#allocation5], 4294967280 }
 0x31b PF: > { %s15_s12 = sadd.s32 1, %s528_s12  }
 0x31c   : > { %p12_p4 = scmp.ge.s32.totalorder %s15_s12, 4  }
 0x31e   :  { %14 = sbr.rel (!%p12_p4) target bundleno = 2 (0x2), region = 75 }
 0x325   :  { %341 = vsyncpa [#allocation4], 1 }
 0x326   :  { %343 = vsyncpa [#allocation4 + $0x1], 1 }
 0x327   :  { %344 = vsyncpa [#allocation5], 1 }
 0x328   :  { %346 = vsyncpa [#allocation5 + $0x1], 1 }

</bundles_post_ra>
